<compile_context>
chip_gen: v5e
topology: v5e:2x2
jax: 0.10.0
libtpu: 0.0.40
codegen_flags: <defaults>
</compile_context>

<pallas_src>
import functools

import jax
import jax.numpy as jnp
from jax.experimental import pallas as pl
from jax.experimental.pallas import tpu as pltpu


def _round_up(x, m):
    return (x + m - 1) // m * m


def _sublane(dtype):
    # native sublane multiple per dtype: f32 -> 8, bf16 -> 16, 8-bit -> 32
    return 8 * (4 // jnp.dtype(dtype).itemsize)


def _pick_lane_tile(dim_p, block, prefer_split):
    """dim_p is a multiple of 128; returns a multiple of 128 dividing dim_p."""
    if dim_p <= block:
        if prefer_split and dim_p >= 256 and dim_p % 256 == 0:
            return dim_p // 2          # >=2 output tiles so v7x megacore can split j
        return dim_p
    t = (block // 128) * 128
    while dim_p % t != 0:
        t -= 128
    return t


# ---------------------------------------------------------------------------
# Parameter setup mirroring FC.__init__ (transpose + pad + cast ONCE).
# ---------------------------------------------------------------------------
def make_fc_params(key, in_channels, out_channels, gain=2 ** 0.5, use_wscale=False,
                   lrmul=1.0, bias_value=None, compute_dtype=jnp.bfloat16,
                   fold_w_lrmul=False):
    he_std = gain * in_channels ** (-0.5)
    if use_wscale:
        init_std = 1.0 / lrmul
        w_lrmul = he_std * lrmul
    else:
        init_std = he_std / lrmul
        w_lrmul = lrmul
    weight = jax.random.normal(key, (out_channels, in_channels), jnp.float32) * init_std
    wt = weight.T                                           # (IN, OUT), f32
    if fold_w_lrmul:
        wt = wt * jnp.float32(w_lrmul)
        w_lrmul = 1.0
    INp = _round_up(in_channels, 128)
    OUTp = _round_up(out_channels, 128)
    if (INp, OUTp) != (in_channels, out_channels):
        wt = jnp.pad(wt, ((0, INp - in_channels), (0, OUTp - out_channels)))
    weight_t = wt.astype(compute_dtype)                     # pad/cast once at setup
    b = jnp.zeros((out_channels,), jnp.float32) if bias_value is None else bias_value
    bias2d = (b.astype(jnp.float32) * jnp.float32(lrmul)).reshape(1, out_channels)
    if OUTp != out_channels:
        bias2d = jnp.pad(bias2d, ((0, 0), (0, OUTp - out_channels)))
    return weight_t, bias2d, float(w_lrmul)


def make_fc_stack_params(key, dlatent, n_layers, gain=2 ** 0.5, use_wscale=False,
                         lrmul=1.0, compute_dtype=jnp.bfloat16, bias_values=None):
    keys = jax.random.split(key, n_layers)
    wts, bs = [], []
    for li in range(n_layers):
        bval = None if bias_values is None else bias_values[li]
        wt, b2d, _ = make_fc_params(keys[li], dlatent, dlatent, gain=gain,
                                    use_wscale=use_wscale, lrmul=lrmul,
                                    bias_value=bval, compute_dtype=compute_dtype,
                                    fold_w_lrmul=True)
        wts.append(wt)
        bs.append(b2d)
    return jnp.stack(wts), jnp.stack(bs)          # (L, D, D) bf16, (L, 1, D) f32


# ---------------------------------------------------------------------------
# 1) Single FC layer.
#    Fast path (K fits one tile): 2-D grid, no scratch, no init/finalize.
#    Fallback (K tiled): 3-D grid with an f32 accumulator scratch.
# ---------------------------------------------------------------------------
def _fc_single_pass_kernel(x_ref, wt_ref, b_ref, o_ref, *, w_lrmul, neg_slope):
    acc = jnp.dot(x_ref[...], wt_ref[...], preferred_element_type=jnp.float32)
    acc = acc * jnp.float32(w_lrmul) + b_ref[...]
    o_ref[...] = jnp.maximum(acc, acc * jnp.float32(neg_slope)).astype(o_ref.dtype)


def _fc_tiled_kernel(x_ref, wt_ref, b_ref, o_ref, acc_ref, *, w_lrmul, neg_slope):
    k = pl.program_id(2)

    @pl.when(k == 0)
    def _init():
        acc_ref[...] = jnp.zeros_like(acc_ref)

    acc_ref[...] += jnp.dot(x_ref[...], wt_ref[...],
                            preferred_element_type=jnp.float32)

    @pl.when(k == pl.num_programs(2) - 1)
    def _finalize():
        acc = acc_ref[...] * jnp.float32(w_lrmul) + b_ref[...]
        o_ref[...] = jnp.maximum(acc, acc * jnp.float32(neg_slope)).astype(o_ref.dtype)


def fc_forward(x, weight_t, bias2d, out_features, *, w_lrmul=1.0, neg_slope=0.2,
               block_m=128, block_n=512, block_k=512, out_dtype=None):
    """y = leaky_relu((x @ weight_t) * w_lrmul + bias2d, neg_slope).

    x:        (B, IN)               activation (fed to the MXU in its own dtype)
    weight_t: (INp, OUTp) bf16      pre-transposed/padded weight from make_fc_params
    bias2d:   (1, OUTp) f32         bias already scaled by b_lrmul and padded
    """
    B, IN = x.shape
    INp, OUTp = weight_t.shape
    assert INp % 128 == 0 and OUTp % 128 == 0 and INp >= IN and OUTp >= out_features
    assert bias2d.shape == (1, OUTp)
    out_dtype = x.dtype if out_dtype is None else out_dtype

    tm = min(block_m, _round_up(B, _sublane(x.dtype)))
    Bp = _round_up(B, tm)
    tn = _pick_lane_tile(OUTp, block_n, prefer_split=True)
    tk = _pick_lane_tile(INp, block_k, prefer_split=False)

    if (Bp, INp) != (B, IN):                       # activation pad only; weight pre-padded
        x = jnp.pad(x, ((0, Bp - B), (0, INp - IN)))

    k_tiles = INp // tk
    cost = pl.CostEstimate(
        flops=2 * Bp * INp * OUTp,
        transcendentals=0,
        bytes_accessed=(Bp * INp * jnp.dtype(x.dtype).itemsize
                        + INp * OUTp * jnp.dtype(weight_t.dtype).itemsize
                        + OUTp * 4
                        + Bp * OUTp * jnp.dtype(out_dtype).itemsize))

    if k_tiles == 1:
        # Fast path: no scratch, single K pass, lane-dense direct store.
        kernel = functools.partial(_fc_single_pass_kernel,
                                   w_lrmul=float(w_lrmul), neg_slope=float(neg_slope))
        grid_spec = pltpu.PrefetchScalarGridSpec(
            num_scalar_prefetch=0,
            grid=(Bp // tm, OUTp // tn),
            in_specs=[pl.BlockSpec((tm, INp), lambda i, j: (i, 0)),
                      pl.BlockSpec((INp, tn), lambda i, j: (0, j)),
                      pl.BlockSpec((1, tn), lambda i, j: (0, j))],
            out_specs=pl.BlockSpec((tm, tn), lambda i, j: (i, j)))
        dims = ("parallel", "parallel")
    else:
        kernel = functools.partial(_fc_tiled_kernel,
                                   w_lrmul=float(w_lrmul), neg_slope=float(neg_slope))
        grid_spec = pltpu.PrefetchScalarGridSpec(
            num_scalar_prefetch=0,
            grid=(Bp // tm, OUTp // tn, k_tiles),            # reduction axis last
            in_specs=[pl.BlockSpec((tm, tk), lambda i, j, k: (i, k)),
                      pl.BlockSpec((tk, tn), lambda i, j, k: (k, j)),
                      pl.BlockSpec((1, tn), lambda i, j, k: (0, j))],
            out_specs=pl.BlockSpec((tm, tn), lambda i, j, k: (i, j)),
            scratch_shapes=[pltpu.VMEM((tm, tn), jnp.float32)])
        dims = ("parallel", "parallel", "arbitrary")

    out = pl.pallas_call(
        kernel,
        out_shape=jax.ShapeDtypeStruct((Bp, OUTp), out_dtype),
        grid_spec=grid_spec,
        compiler_params=pltpu.CompilerParams(
            dimension_semantics=dims,
            vmem_limit_bytes=32 * 1024 * 1024),
        cost_estimate=cost,
    )(x, weight_t, bias2d)

    if (Bp, OUTp) != (B, out_features):
        out = out[:B, :out_features]
    return out


# ---------------------------------------------------------------------------
# 2) Fused mapping network: 4 x FC(dlatent, dlatent) in ONE kernel.
#    Layer axis is a pipelined grid dimension: layer l+1 weights are DMA'd while
#    layer l computes; the activation carries across layers in a VMEM scratch.
# ---------------------------------------------------------------------------
def _fc_stack_kernel(x_ref, w_ref, b_ref, o_ref, h_ref, *, neg_slope):
    l = pl.program_id(1)

    @pl.when(l == 0)
    def _load_input():
        h_ref[...] = x_ref[...]

    acc = jnp.dot(h_ref[...], w_ref[0], preferred_element_type=jnp.float32)
    acc = acc + b_ref[0]
    acc = jnp.maximum(acc, acc * jnp.float32(neg_slope))     # leaky_relu(0.2)
    h_ref[...] = acc.astype(h_ref.dtype)                     # next layer's MXU input
    o_ref[...] = acc.astype(o_ref.dtype)                     # last layer's write survives


def fc_stack_forward(x, w_stack, b_stack, *, neg_slope=0.2, block_m=256, out_dtype=None):
    """x: (B, D); w_stack: (L, D, D) bf16 (w_lrmul folded); b_stack: (L, 1, D) f32."""
    B, D = x.shape
    L, Din, Dout = w_stack.shape
    assert Din == D and Dout == D and D % 128 == 0
    assert b_stack.shape == (L, 1, D)
    out_dtype = x.dtype if out_dtype is None else out_dtype

    tm = min(block_m, _round_up(B, _sublane(x.dtype)))
    Bp = _round_up(B, tm)
    if Bp != B:
        x = jnp.pad(x, ((0, Bp - B), (0, 0)))

    kernel = functools.partial(_fc_stack_kernel, neg_slope=float(neg_slope))
    out = pl.pallas_call(
        kernel,
        out_shape=jax.ShapeDtypeStruct((Bp, D), out_dtype),
        grid_spec=pltpu.PrefetchScalarGridSpec(
            num_scalar_prefetch=0,
            grid=(Bp // tm, L),                              # layer axis last (carried dep)
            in_specs=[pl.BlockSpec((tm, D), lambda i, l: (i, 0)),
                      pl.BlockSpec((1, D, D), lambda i, l: (l, 0, 0)),
                      pl.BlockSpec((1, 1, D), lambda i, l: (l, 0, 0))],
            out_specs=pl.BlockSpec((tm, D), lambda i, l: (i, 0)),
            scratch_shapes=[pltpu.VMEM((tm, D), x.dtype)]),
        compiler_params=pltpu.CompilerParams(
            dimension_semantics=("parallel", "arbitrary"),
            vmem_limit_bytes=32 * 1024 * 1024),
    )(x, w_stack, b_stack)

    return out[:B] if Bp != B else out


# ---------------------------------------------------------------------------
# References (same bf16 rounding as the kernels, f32 HIGHEST-precision matmul)
# ---------------------------------------------------------------------------
def fc_reference(x, weight_t, bias2d, out_features, w_lrmul, neg_slope=0.2):
    acc = jnp.dot(x.astype(jnp.float32), weight_t.astype(jnp.float32)[:x.shape[1], :],
                  precision=jax.lax.Precision.HIGHEST)
    acc = acc * jnp.float32(w_lrmul) + bias2d.astype(jnp.float32)
    acc = jnp.where(acc >= 0, acc, acc * neg_slope)
    return acc[:, :out_features]


def fc_stack_reference(x, w_stack, b_stack, neg_slope=0.2, compute_dtype=jnp.bfloat16):
    h = x.astype(compute_dtype)
    acc = None
    for l in range(w_stack.shape[0]):
        acc = jnp.dot(h.astype(jnp.float32), w_stack[l].astype(jnp.float32),
                      precision=jax.lax.Precision.HIGHEST)
        acc = acc + b_stack[l].astype(jnp.float32)
        acc = jnp.where(acc >= 0, acc, acc * neg_slope)
        h = acc.astype(compute_dtype)
    return acc


if __name__ == "__main__":
    key = jax.random.PRNGKey(0)
    k_lat, k_wst, k_bst, k_wtext, k_stack, k_bias = jax.random.split(key, 6)

    batch = 8
    dlatent = 256            # small stand-in for the module's dlatent_size = 512
    channels = dlatent       # AdaIN channel count == dlatent_size in AdaIN_FC_Block
    compute_dtype = jnp.bfloat16

    # --- (a) ApplyStyle's FC: FC(dlatent, 2*channels, gain=1.0, use_wscale=True) ---
    latent = jax.random.normal(k_lat, (batch, dlatent), jnp.float32)
    # Nonzero (pre-folded) bias to exercise the bias path; PyTorch init is zeros.
    b_style = 0.1 * jax.random.normal(k_bst, (2 * channels,), jnp.float32)
    wt_style, b2d_style, lr_style = make_fc_params(
        k_wst, dlatent, 2 * channels, gain=1.0, use_wscale=True,
        bias_value=b_style, compute_dtype=compute_dtype)

    x_style = latent.astype(compute_dtype)
    out_style = fc_forward(x_style, wt_style, b2d_style, 2 * channels,
                           w_lrmul=lr_style, out_dtype=jnp.float32)
    out_style = jax.block_until_ready(out_style)
    ref_style = fc_reference(x_style, wt_style, b2d_style, 2 * channels, lr_style)
    assert out_style.shape == (batch, 2 * channels)
    assert jnp.allclose(out_style, ref_style, atol=2e-3, rtol=2e-3), "FC mismatch"

    # --- (a') same FC through the K-tiled fallback path (block_k < IN) ---
    out_style_kt = fc_forward(x_style, wt_style, b2d_style, 2 * channels,
                              w_lrmul=lr_style, out_dtype=jnp.float32, block_k=128)
    out_style_kt = jax.block_until_ready(out_style_kt)
    assert jnp.allclose(out_style_kt, ref_style, atol=2e-3, rtol=2e-3), \
        "FC k-tiled mismatch"

    # --- (b) Mapping network: 4 x FC(dlatent, dlatent), layer-pipelined kernel ---
    w_text = jax.random.normal(k_wtext, (batch, dlatent), jnp.float32)
    bias_vals = [0.05 * jax.random.normal(jax.random.fold_in(k_bias, li),
                                          (dlatent,), jnp.float32)
                 for li in range(4)]
    w_stack, b_stack = make_fc_stack_params(k_stack, dlatent, 4,
                                            compute_dtype=compute_dtype,
                                            bias_values=bias_vals)

    x_map = w_text.astype(compute_dtype)
    out_map = fc_stack_forward(x_map, w_stack, b_stack, out_dtype=jnp.float32)
    out_map = jax.block_until_ready(out_map)
    ref_map = fc_stack_reference(x_map, w_stack, b_stack, compute_dtype=compute_dtype)
    assert out_map.shape == (batch, dlatent)
    assert jnp.allclose(out_map, ref_map, atol=1e-2, rtol=1e-2), "FC stack mismatch"

    print("KERNEL_OK")
</pallas_src>

<mosaic_0001>
module attributes {stable_mosaic.version = 11 : i64} {
  func.func @_fc_single_pass_kernel(%arg0: i32, %arg1: i32, %arg2: memref<16x256xbf16, #tpu.memory_space<vmem>>, %arg3: memref<256x256xbf16, #tpu.memory_space<vmem>>, %arg4: memref<1x256xf32, #tpu.memory_space<vmem>>, %arg5: memref<16x256xf32, #tpu.memory_space<vmem>>) attributes {dimension_semantics = [#tpu.dimension_semantics<parallel>, #tpu.dimension_semantics<parallel>], iteration_bounds = array<i64: 1, 2>, scalar_prefetch = 0 : i64, scratch_operands = 0 : i64, tpu.core_type = #tpu.core_type<tc>, window_params = [{transform_indices = @transform_0, window_bounds = array<i64: 16, 256>}, {transform_indices = @transform_1, window_bounds = array<i64: 256, 256>}, {transform_indices = @transform_2, window_bounds = array<i64: 1, 256>}, {transform_indices = @transform_3, window_bounds = array<i64: 16, 256>}]} {
    %c0 = arith.constant 0 : index
    %c0_0 = arith.constant 0 : index
    %0 = vector.load %arg2[%c0, %c0_0] : memref<16x256xbf16, #tpu.memory_space<vmem>>, vector<16x256xbf16>
    %c0_1 = arith.constant 0 : index
    %c0_2 = arith.constant 0 : index
    %1 = vector.load %arg3[%c0_1, %c0_2] : memref<256x256xbf16, #tpu.memory_space<vmem>>, vector<256x256xbf16>
    %cst = arith.constant dense<0.000000e+00> : vector<16x256xf32>
    %2 = tpu.matmul %0, %1, %cst {dimension_numbers = #tpu.dot_dimension_numbers<[1], [0], [0], [1], [0, 0, 1, 1], [], []>} : vector<16x256xbf16>, vector<256x256xbf16>, vector<16x256xf32> -> vector<16x256xf32>
    %cst_3 = arith.constant 6.250000e-02 : f32
    %3 = vector.broadcast %cst_3 : f32 to vector<16x256xf32>
    %4 = arith.mulf %2, %3 : vector<16x256xf32>
    %c0_4 = arith.constant 0 : index
    %c0_5 = arith.constant 0 : index
    %5 = vector.load %arg4[%c0_4, %c0_5] : memref<1x256xf32, #tpu.memory_space<vmem>>, vector<1x256xf32>
    %6 = vector.broadcast %5 : vector<1x256xf32> to vector<16x256xf32>
    %7 = arith.addf %4, %6 : vector<16x256xf32>
    %cst_6 = arith.constant 2.000000e-01 : f32
    %8 = vector.broadcast %cst_6 : f32 to vector<16x256xf32>
    %9 = arith.mulf %7, %8 : vector<16x256xf32>
    %10 = arith.maximumf %7, %9 : vector<16x256xf32>
    %c0_7 = arith.constant 0 : index
    %c0_8 = arith.constant 0 : index
    %11 = vector.load %arg5[%c0_7, %c0_8] : memref<16x256xf32, #tpu.memory_space<vmem>>, vector<16x256xf32>
    tpu.vector_store %arg5[%c0_7, %c0_8], %10 {strides = array<i32>} : memref<16x256xf32, #tpu.memory_space<vmem>>, vector<16x256xf32>,
    return
  }
  func.func @transform_0(%arg0: i32, %arg1: i32) -> (i32, i32) {
    %c0_i32 = arith.constant 0 : i32
    %c0_i32_0 = arith.constant 0 : i32
    return %arg0, %c0_i32 : i32, i32
  }
  func.func @transform_1(%arg0: i32, %arg1: i32) -> (i32, i32) {
    %c0_i32 = arith.constant 0 : i32
    %c0_i32_0 = arith.constant 0 : i32
    return %c0_i32, %arg1 : i32, i32
  }
  func.func @transform_2(%arg0: i32, %arg1: i32) -> (i32, i32) {
    %c0_i32 = arith.constant 0 : i32
    %c0_i32_0 = arith.constant 0 : i32
    return %c0_i32, %arg1 : i32, i32
  }
  func.func @transform_3(%arg0: i32, %arg1: i32) -> (i32, i32) {
    %c0_i32 = arith.constant 0 : i32
    return %arg0, %arg1 : i32, i32
  }
}

</mosaic_0001>

<bundles_post_ra>
// kernel: tpu_custom_call.1
= control target key start
LH: loop header
LB: loop body
LE: loop exit
PB: predicated region body
PF: predicated region fallthrough
CT: control target
= control target key end

     0   :  { %s1419_s0 = inlined_call_operand.hbm [shape: bf16[16,256], index: 0, kind: input, shape index: {}]   ;;  %s1420_s1 = inlined_call_operand.hbm [shape: bf16[256,512], index: 1, kind: input, shape index: {}]   ;;  %s1421_s2 = inlined_call_operand.hbm [shape: f32[1,512], index: 2, kind: input, shape index: {}]   ;;  %s1422_s3 = inlined_call_operand.hbm [shape: f32[16,512], index: 3, kind: output, shape index: {}]  }
   0x1   :  { %1425 = sst [smem:[#allocation12_spill]] %s1419_s0 }
   0x2   :  { %1426 = sst [smem:[#allocation13_spill]] %s1420_s1 }
   0x3   :  { %8 = vsyncpa [#allocation3], 0 }
   0x4   :  { %9 = vsyncpa [#allocation6], 0 }
   0x5   :  { %11 = vsyncpa [#allocation6 + $0x1], 0 }
   0x6   :  { %12 = vsyncpa [#allocation4], 0 }
   0x7   :  { %14 = vsyncpa [#allocation4 + $0x1], 0  ;;  %s1176_s12 = smov 0   ;;  %s1178_s13 = smov 0  }
   0x8   :  { %s1180_s14 = smov 0   ;;  %s1182_s15 = smov 0  }
   0x9   :  { %s1184_s16 = smov 0   ;;  %s1186_s17 = smov 0  }
   0xa LB: > { %s29_s18 = sadd.s32 1, %s1143_s16  ;;  %s65_s19 = sadd.s32 1, %s1135_s14  ;;  %s1147_s17 = sphi %s1186_s17, %s20_s17   ;;  %s1143_s16 = sphi %s1184_s16, %s1441_s16   ;;  %s1139_s15 = sphi %s1182_s15, %s1440_s15   ;;  %s1135_s14 = sphi %s1180_s14, %s1439_s14   ;;  %s1131_s13 = sphi %s1178_s13, %s1438_s13   ;;  %s1127_s12 = sphi %s1176_s12, %s1437_s12  }
   0xb   : > { %p30_p0 = scmp.ge.s32.totalorder %s29_s18, 2  ;;  %p72_p1 = scmp.ne.s32.totalorder %s1135_s14, %s1131_s13 }
   0xc   : > { %p73_p2 = scmp.eq.s32.totalorder %s1147_s17, 0  ;;  %p699_p4 = scmp.ge.s32.totalorder %s1147_s17, 2 }
   0xd   : > { %s1443_s18 = smov (%p30_p0, %s29_s18), 0  ;;  %p913_p6 = scmp.lt.s32.totalorder %s1147_s17, 2 }
   0xe   : > { %p1216_p3 = por %p73_p2, %p72_p1  ;;  %s62_s21 = ssub.s32 %s1143_s16, %s1443_s18 }
   0xf   : > { %p63_p5 = scmp.eq.s32.totalorder %s62_s21, 0  ;;  %s174_s22 = sand.u32 1, %s1147_s17  }
  0x10   : > { %s176_s23 = sand.u32 1, %s1135_s14   ;;  %s851_s26 = sshll.u32 %s1143_s16, 3 }
  0x11   : > { %s1227_s24 = scalar_select %p63_p5, %s1135_s14, %s65_s19  }
  0x12   : > { %s700_s25 = sshll.u32 %s176_s23, 8  ;;  %s1428_s1 = sld [smem:[#allocation13_spill]] }
  0x13   : > { %s178_s30 = scalar_lea.vmem [#allocation5], %s700_s25  ;;  %p1237_p7 = pnand %p913_p6, %p1216_p3 }
  0x14   : > { %s186_s4 = sshll.u32 %s178_s30, 4  ;;  %s1241_s7 = scalar_lea.sflag [#allocation6], %s174_s22  ;;  %s187_s4 = int_to_ptr.vmem [resolvable:$true] %s186_s4 }
  0x15   : > { %s1149_s8 = smov 256   ;;  %s1423_s9 = smov 128  }
  0x16   : > { %s1424_s10 = smov 8   ;;  %s1249_s11 = sadd.s32 4294967295, %s1147_s17  }
  0x17   : > { %s696_s19 = sadd.s32 4294967294, %s1147_s17   ;;  %p78_p8 = scmp.ne.s32.totalorder %s1131_s13, %s1127_s12 }
  0x18   : > { %s183_s29 = scalar_lea.hbm %s1428_s1, %s851_s26  ;;  %p79_p9 = scmp.eq.s32.totalorder %s1249_s11, 0 }
  0x19   : > { %s184_s5 = sshll.u32 %s183_s29, 4  ;;  %p130_p10 = scmp.eq.s32.totalorder %s1249_s11, 1  ;;  %s185_s5 = int_to_ptr.hbm [resolvable:$true] %s184_s5 }
  0x1a   : > { %904 = dma.hbm_to_vmem [thread:$0]  (!%p1237_p7), %s185_s5, 4096, %s187_s4, %s1241_s7, %s1149_s8, %s1423_s9, %s1424_s10  }
  0x1b   : > { %p136_p11 = scmp.eq.s32.totalorder %s696_s19, 1  ;;  %p1258_p12 = por %p79_p9, %p78_p8 }
  0x1c   : > { %p697_p13 = scmp.ge.s32.totalorder %s1147_s17, 1  ;;  %p1266_p0 = por %p130_p10, %p72_p1 }
  0x1d   : > { %p1270_p2 = por %p136_p11, %p78_p8  ;;  %p143_p3 = scmp.lt.s32.totalorder %s1147_s17, 3 }
  0x1e   : > { %s1433_s0 = sld [smem:[#allocation12_spill]]  ;;  %s1152_s29 = smov [#allocation2]  }
  0x1f   : > { %p1278_p5 = pnand %p697_p13, %p143_p3  ;;  %s160_s30 = sshll.u32 %s1152_s29, 4  ;;  %s161_s30 = int_to_ptr.vmem [resolvable:$true] %s160_s30 }
  0x20   : > { %s703_s4 = sshll.u32 %s176_s23, 1  ;;  %s704_s5 = sshll.u32 %s1143_s16, 1 }
  0x21   : > { %p897_p1 = pneg %p1278_p5  ;;  %s204_s25 = scalar_lea.hbm %s1421_s2, %s704_s5 }
  0x22   : > { %s206_s26 = sshll.u32 %s204_s25, 4  ;;  %s200_s9 = scalar_lea.vmem [#allocation7], %s703_s4  ;;  %s207_s26 = int_to_ptr.hbm [resolvable:$true] %s206_s26 }
  0x23   : > { %p898_p6 = pnand %p897_p1, %p79_p9  ;;  %s208_s10 = sshll.u32 %s200_s9, 4  ;;  %s209_s10 = int_to_ptr.vmem [resolvable:$true] %s208_s10 }
  0x24   : > { %s158_s27 = sshll.u32 %s1433_s0, 4  ;;  %s1435_s0 = smov 8   ;;  %s159_s27 = int_to_ptr.hbm [resolvable:$true] %s158_s27 }
  0x25   : > { %s1436_s1 = smov 128   ;;  %217 = sbr.rel (%p1278_p5) target bundleno = 239 (0xef), region = 32 }
  0x26   : > { %900 = dma.hbm_to_vmem [thread:$0]  (!%p898_p6), %s159_s27, 256, %s161_s30, [#allocation3], %s1436_s1, %s1436_s1, %s1435_s0  }
  0x27   : > { %907 = dma.hbm_to_vmem [thread:$0]  (!%p1237_p7), %s207_s26, 32, %s209_s10, %s1241_s7  }
  0x2a   : > { %1114 = dma.done.wait (%p79_p9), [#allocation3], 256  }
  0x2b   : > { %1116 = vsyncadd (%p79_p9), [#allocation3], 4294967040  ;;  %s224_s23 = sand.u32 1, %s1249_s11   ;;  %s1306_s9 = sand.u32 1, %s1131_s13  }
  0x2c   : > { %s707_s0 = sshll.u32 %s1306_s9, 8  ;;  %s225_s1 = scalar_lea.sflag [#allocation6], %s224_s23 }
  0x2d   : > { %s1309_s6 = scalar_lea.vmem [#allocation5], %s707_s0 }
  0x2e   : > { %1118 = dma.done.wait (%p1258_p12), %s225_s1, 4128  }
  0x2f   : > { %1120 = vsyncadd (%p1258_p12), %s225_s1, 4294963168  ;;  %v776_v0 = vld [vmem:[%s1309_s6 + $0x70] sm:$0xf]  ;;  %v869_v1 = vld [vmem:[%s1309_s6 + $0x74] sm:$0xf0]  ;;  %s708_s7 = sshll.u32 %s1306_s9, 1 }
  0x30   : > { %v840_v2 = vld [vmem:[%s1309_s6 + $0xf0] sm:$0xf]  ;;  %v777_v3 = vor.u32 %v869_v1, %v776_v0  ;;  %v885_v4 = vld [vmem:[%s1309_s6 + $0xf4] sm:$0xf0]  ;;  %v868_v5 = vld [vmem:[%s1309_s6 + $0x74] sm:$0xf] }
  0x31   : > { %v778_v6 = vld [vmem:[%s1309_s6 + $0x78] sm:$0xf0]  ;;  %v841_v7 = vor.u32 %v885_v4, %v840_v2  ;;  %v884_v9 = vld [vmem:[%s1309_s6 + $0xf4] sm:$0xf]  ;;  %v768_v11 = vld [vmem:[%s1309_s6 + $0x60] sm:$0xf] }
  0x32   : > { %v781_v8 = vor.u32 %v868_v5, %v778_v6  ;;  %v842_v10 = vld [vmem:[%s1309_s6 + $0xf8] sm:$0xf0]  ;;  %476 = vmatpush.bf16.msra.mxu0 %v777_v3  ;;  %v867_v13 = vld [vmem:[%s1309_s6 + $0x64] sm:$0xf0]  ;;  %v832_v14 = vld [vmem:[%s1309_s6 + $0xe0] sm:$0xf] }
  0x33   : > { %v845_v12 = vor.u32 %v884_v9, %v842_v10  ;;  %v883_v15 = vld [vmem:[%s1309_s6 + $0xe4] sm:$0xf0]  ;;  %490 = vmatpush.bf16.msra.mxu1 %v841_v7  ;;  %v769_v16 = vor.u32 %v867_v13, %v768_v11  ;;  %v866_v18 = vld [vmem:[%s1309_s6 + $0x64] sm:$0xf]  ;;  %v770_v19 = vld [vmem:[%s1309_s6 + $0x68] sm:$0xf0] }
  0x34   : > { %504 = vmatpush.bf16.msra.mxu2 %v781_v8  ;;  %v833_v17 = vor.u32 %v883_v15, %v832_v14  ;;  %v882_v20 = vld [vmem:[%s1309_s6 + $0xe4] sm:$0xf]  ;;  %v773_v21 = vor.u32 %v866_v18, %v770_v19  ;;  %v834_v22 = vld [vmem:[%s1309_s6 + $0xe8] sm:$0xf0]  ;;  %v760_v23 = vld [vmem:[%s1309_s6 + $0x50] sm:$0xf] }
  0x35   : > { %518 = vmatpush.bf16.msra.mxu3 %v845_v12  ;;  %v865_v24 = vld [vmem:[%s1309_s6 + $0x54] sm:$0xf0]  ;;  %v837_v25 = vor.u32 %v882_v20, %v834_v22  ;;  %v824_v26 = vld [vmem:[%s1309_s6 + $0xd0] sm:$0xf]  ;;  %v864_v28 = vld [vmem:[%s1309_s6 + $0x54] sm:$0xf] }
  0x36   : > { %v881_v27 = vld [vmem:[%s1309_s6 + $0xd4] sm:$0xf0]  ;;  %477 = vmatpush.bf16.msra.mxu0 %v769_v16  ;;  %v761_v29 = vor.u32 %v865_v24, %v760_v23  ;;  %v762_v30 = vld [vmem:[%s1309_s6 + $0x58] sm:$0xf0]  ;;  %v880_v31 = vld [vmem:[%s1309_s6 + $0xd4] sm:$0xf] }
  0x37   : > { %v826_v32 = vld [vmem:[%s1309_s6 + $0xd8] sm:$0xf0]  ;;  %491 = vmatpush.bf16.msra.mxu1 %v833_v17  ;;  %v825_v33 = vor.u32 %v881_v27, %v824_v26  ;;  %v765_v34 = vor.u32 %v864_v28, %v762_v30  ;;  %v752_v35 = vld [vmem:[%s1309_s6 + $0x40] sm:$0xf]  ;;  %v863_v36 = vld [vmem:[%s1309_s6 + $0x44] sm:$0xf0] }
  0x38   : > { %505 = vmatpush.bf16.msra.mxu2 %v773_v21  ;;  %v816_v37 = vld [vmem:[%s1309_s6 + $0xc0] sm:$0xf]  ;;  %v829_v38 = vor.u32 %v880_v31, %v826_v32  ;;  %v879_v39 = vld [vmem:[%s1309_s6 + $0xc4] sm:$0xf0]  ;;  %v862_v40 = vld [vmem:[%s1309_s6 + $0x44] sm:$0xf]  ;;  %v753_v44 = vor.u32 %v863_v36, %v752_v35 }
  0x39   : > { %519 = vmatpush.bf16.msra.mxu3 %v837_v25  ;;  %v754_v41 = vld [vmem:[%s1309_s6 + $0x48] sm:$0xf0]  ;;  %v878_v42 = vld [vmem:[%s1309_s6 + $0xc4] sm:$0xf]  ;;  %v817_v45 = vor.u32 %v879_v39, %v816_v37  ;;  %v744_v47 = vld [vmem:[%s1309_s6 + $0x30] sm:$0xf] }
  0x3a   : > { %v818_v43 = vld [vmem:[%s1309_s6 + $0xc8] sm:$0xf0]  ;;  %478 = vmatpush.bf16.msra.mxu0 %v761_v29  ;;  %v757_v46 = vor.u32 %v862_v40, %v754_v41  ;;  %v861_v48 = vld [vmem:[%s1309_s6 + $0x34] sm:$0xf0]  ;;  %v808_v49 = vld [vmem:[%s1309_s6 + $0xb0] sm:$0xf] }
  0x3b   : > { %492 = vmatpush.bf16.msra.mxu1 %v825_v33  ;;  %v821_v50 = vor.u32 %v878_v42, %v818_v43  ;;  %v877_v51 = vld [vmem:[%s1309_s6 + $0xb4] sm:$0xf0]  ;;  %v860_v52 = vld [vmem:[%s1309_s6 + $0x34] sm:$0xf]  ;;  %v746_v53 = vld [vmem:[%s1309_s6 + $0x38] sm:$0xf0]  ;;  %v745_v56 = vor.u32 %v861_v48, %v744_v47 }
  0x3c   : > { %506 = vmatpush.bf16.msra.mxu2 %v765_v34  ;;  %v876_v54 = vld [vmem:[%s1309_s6 + $0xb4] sm:$0xf]  ;;  %v810_v55 = vld [vmem:[%s1309_s6 + $0xb8] sm:$0xf0]  ;;  %v809_v57 = vor.u32 %v877_v51, %v808_v49  ;;  %v749_v58 = vor.u32 %v860_v52, %v746_v53  ;;  %v736_v59 = vld [vmem:[%s1309_s6 + $0x20] sm:$0xf] }
  0x3d   : > { %520 = vmatpush.bf16.msra.mxu3 %v829_v38  ;;  %v859_v60 = vld [vmem:[%s1309_s6 + $0x24] sm:$0xf0]  ;;  %v800_v61 = vld [vmem:[%s1309_s6 + $0xa0] sm:$0xf]  ;;  %v813_v62 = vor.u32 %v876_v54, %v810_v55  ;;  %v858_v0 = vld [vmem:[%s1309_s6 + $0x24] sm:$0xf] }
  0x3e   : > { %479 = vmatpush.bf16.msra.mxu0 %v753_v44  ;;  %v875_v63 = vld [vmem:[%s1309_s6 + $0xa4] sm:$0xf0]  ;;  %v738_v1 = vld [vmem:[%s1309_s6 + $0x28] sm:$0xf0]  ;;  %v874_v2 = vld [vmem:[%s1309_s6 + $0xa4] sm:$0xf]  ;;  %v737_v4 = vor.u32 %v859_v60, %v736_v59 }
  0x3f   : > { %493 = vmatpush.bf16.msra.mxu1 %v817_v45  ;;  %v802_v3 = vld [vmem:[%s1309_s6 + $0xa8] sm:$0xf0]  ;;  %v801_v5 = vor.u32 %v875_v63, %v800_v61  ;;  %v741_v6 = vor.u32 %v858_v0, %v738_v1  ;;  %v728_v7 = vld [vmem:[%s1309_s6 + $0x10] sm:$0xf]  ;;  %v857_v8 = vld [vmem:[%s1309_s6 + $0x14] sm:$0xf0] }
  0x40   : > { %507 = vmatpush.bf16.msra.mxu2 %v757_v46  ;;  %v792_v9 = vld [vmem:[%s1309_s6 + $0x90] sm:$0xf]  ;;  %v805_v10 = vor.u32 %v874_v2, %v802_v3  ;;  %v873_v11 = vld [vmem:[%s1309_s6 + $0x94] sm:$0xf0]  ;;  %v856_v12 = vld [vmem:[%s1309_s6 + $0x14] sm:$0xf]  ;;  %v729_v16 = vor.u32 %v857_v8, %v728_v7 }
  0x41   : > { %521 = vmatpush.bf16.msra.mxu3 %v821_v50  ;;  %v730_v13 = vld [vmem:[%s1309_s6 + $0x18] sm:$0xf0]  ;;  %v872_v14 = vld [vmem:[%s1309_s6 + $0x94] sm:$0xf]  ;;  %v793_v17 = vor.u32 %v873_v11, %v792_v9  ;;  %v720_v19 = vld [vmem:[%s1309_s6] sm:$0xf] }
  0x42   : > { %480 = vmatpush.bf16.msra.mxu0 %v745_v56  ;;  %v794_v15 = vld [vmem:[%s1309_s6 + $0x98] sm:$0xf0]  ;;  %v733_v18 = vor.u32 %v856_v12, %v730_v13  ;;  %v855_v20 = vld [vmem:[%s1309_s6 + $0x4] sm:$0xf0]  ;;  %v784_v21 = vld [vmem:[%s1309_s6 + $0x80] sm:$0xf] }
  0x43   : > { %494 = vmatpush.bf16.msra.mxu1 %v809_v57  ;;  %v797_v22 = vor.u32 %v872_v14, %v794_v15  ;;  %v871_v23 = vld [vmem:[%s1309_s6 + $0x84] sm:$0xf0]  ;;  %v854_v24 = vld [vmem:[%s1309_s6 + $0x4] sm:$0xf]  ;;  %v722_v25 = vld [vmem:[%s1309_s6 + $0x8] sm:$0xf0]  ;;  %v721_v28 = vor.u32 %v855_v20, %v720_v19 }
  0x44   : > { %508 = vmatpush.bf16.msra.mxu2 %v749_v58  ;;  %v870_v26 = vld [vmem:[%s1309_s6 + $0x84] sm:$0xf]  ;;  %v786_v27 = vld [vmem:[%s1309_s6 + $0x88] sm:$0xf0]  ;;  %v712_v29 = vld [vmem:[#allocation2] sm:$0xf]  ;;  %v785_v31 = vor.u32 %v871_v23, %v784_v21  ;;  %v725_v32 = vor.u32 %v854_v24, %v722_v25 }
  0x45   : > { %522 = vmatpush.bf16.msra.mxu3 %v813_v62  ;;  %v853_v30 = vld [vmem:[#allocation2 + $0x4] sm:$0xf0]  ;;  %v852_v33 = vld [vmem:[#allocation2 + $0x4] sm:$0xf]  ;;  %v714_v34 = vld [vmem:[#allocation2 + $0x8] sm:$0xf0]  ;;  %v789_v35 = vor.u32 %v870_v26, %v786_v27 }
  0x46   : > { %481 = vmatpush.bf16.msra.mxu0 %v737_v4  ;;  %v713_v36 = vor.u32 %v853_v30, %v712_v29  ;;  %v717_v37 = vor.u32 %v852_v33, %v714_v34  ;;  %s238_s10 = scalar_lea.vmem [#allocation7], %s708_s7  ;;  %s709_s11 = sshll.u32 %s1306_s9, 5 }
  0x47   : > { %495 = vmatpush.bf16.msra.mxu1 %v801_v5  ;;  %v536_v38 = vld [vmem:[%s238_s10] sm:$0x3]  ;;  %s266_s20 = scalar_lea.vmem [#allocation8], %s709_s11  ;;  %s886_s27 = sshll.u32 %s1139_s15, 4 }
  0x48   : > { %509 = vmatpush.bf16.msra.mxu2 %v741_v6  ;;  %v538_v42 = vperm.slane %v536_v38, 0  ;;  %v539_v50 = vperm.slane %v536_v38, 1  ;;  %s573_s30 = scalar_lea.hbm %s1422_s3, %s886_s27  ;;  %s574_s4 = sshll.u32 %s266_s20, 4  ;;  %s575_s4 = int_to_ptr.vmem [resolvable:$true] %s574_s4 }
  0x49   : > { %523 = vmatpush.bf16.msra.mxu3 %v805_v10  ;;  %s576_s5 = sshll.u32 %s573_s30, 4  ;;  %s559_s15 = scalar_lea.sflag [#allocation4], %s1306_s9  ;;  %s577_s5 = int_to_ptr.hbm [resolvable:$true] %s576_s5 }
  0x4a   : > { %482 = vmatpush.bf16.msra.mxu0 %v729_v16  ;;  %s1075_s8 = sshra.s32 %s577_s5, 4  ;;  %s1081_s23 = scalar_lea.hbm %s1422_s3, 64  ;;  %s1076_s8 = int_to_ptr.hbm [resolvable:$true] %s1075_s8 }
  0x4b   : > { %496 = vmatpush.bf16.msra.mxu1 %v793_v17  ;;  %s1077_s19 = scalar_lea.hbm %s1076_s8, 32  ;;  %p1082_p10 = scmp.lt.s32.totalorder %s1076_s8, %s1422_s3 }
  0x4c   : > { %510 = vmatpush.bf16.msra.mxu2 %v733_v18  ;;  %p1078_p7 = scmp.ne.s32.totalorder %s1076_s8, %s1077_s19  ;;  %p1083_p11 = scmp.lt.s32.totalorder %s1081_s23, %s1077_s19 }
  0x4d   : > { %524 = vmatpush.bf16.msra.mxu3 %v797_v22 }
  0x4e   : > { %483 = vmatpush.bf16.msra.mxu0 %v721_v28  ;;  %p1079_p8 = pnand %p1078_p7, %p1266_p0  ;;  %p1084_p12 = por %p1083_p11, %p1082_p10 }
  0x4f   : > { %497 = vmatpush.bf16.msra.mxu1 %v785_v31 }
  0x50   : > { %511 = vmatpush.bf16.msra.mxu2 %v725_v32  ;;  %p1080_p9 = pneg %p1079_p8 }
  0x51   : > { %525 = vmatpush.bf16.msra.mxu3 %v789_v35  ;;  %484 = vmatmul.bf16.vlgmr.msra.gmra.mxu0 %v713_v36 }
  0x52   : > { %498 = vmatmul.bf16.vlgmr.msra.gmra.mxu1 %v717_v37  ;;  %p1085_p13 = pnand %p1084_p12, %p1080_p9 }
  0x53   : > { %512 = vmatmul.bf16.vlgmr.msra.gmra.mxu2 %v713_v36 }
  0x54   : > { %526 = vmatmul.bf16.vlgmr.msra.gmra.mxu3 %v717_v37 }
  0xce   : > { %v485_v39 = vpop.f32.mrf.mxu0 }
  0xcf   : > { %v499_v40 = vpop.f32.mrf.mxu1 }
  0xd0   : > { %v500_v41 = vadd.f32 %v499_v40, %v485_v39 }
  0xd2   : > { %v532_v43 = vmul.f32 0.0625, %v500_v41 }
  0xd4   : > { %v542_v44 = vadd.f32 %v538_v42, %v532_v43 }
  0xd6   : > { %v513_v45 = vpop.f32.mrf.mxu2  ;;  %v546_v46 = vmul.f32 0.2, %v542_v44  ;;  %v487_v48 = vpop.f32.mrf.mxu0 }
  0xd7   : > { %v527_v47 = vpop.f32.mrf.mxu3  ;;  %v501_v51 = vpop.f32.mrf.mxu1 }
  0xd8   : > { %v528_v49 = vadd.f32 %v527_v47, %v513_v45  ;;  %v550_v52 = vmax.f32 %v542_v44, %v546_v46  ;;  %v502_v53 = vadd.f32 %v501_v51, %v487_v48 }
  0xda   : > { %v533_v54 = vmul.f32 0.0625, %v528_v49  ;;  %554 = vst [vmem:[%s266_s20] sm:$0xff] %v550_v52  ;;  %v534_v55 = vmul.f32 0.0625, %v502_v53 }
  0xdc   : > { %v543_v56 = vadd.f32 %v539_v50, %v533_v54  ;;  %v544_v57 = vadd.f32 %v538_v42, %v534_v55 }
  0xde   : > { %v547_v58 = vmul.f32 0.2, %v543_v56  ;;  %v515_v59 = vpop.f32.mrf.mxu2  ;;  %v548_v60 = vmul.f32 0.2, %v544_v57 }
  0xdf   : > { %v529_v61 = vpop.f32.mrf.mxu3 }
  0xe0   : > { %v551_v62 = vmax.f32 %v543_v56, %v547_v58  ;;  %v530_v63 = vadd.f32 %v529_v61, %v515_v59  ;;  %v552_v0 = vmax.f32 %v544_v57, %v548_v60 }
  0xe2   : > { %555 = vst [vmem:[%s266_s20 + $0x8] sm:$0xff] %v551_v62  ;;  %v535_v1 = vmul.f32 0.0625, %v530_v63 }
  0xe3   : > { %556 = vst [vmem:[%s266_s20 + $0x10] sm:$0xff] %v552_v0 }
  0xe4   : > { %v545_v2 = vadd.f32 %v539_v50, %v535_v1 }
  0xe6   : > { %v549_v3 = vmul.f32 0.2, %v545_v2 }
  0xe8   : > { %v553_v4 = vmax.f32 %v545_v2, %v549_v3 }
  0xea   : > { %557 = vst [vmem:[%s266_s20 + $0x18] sm:$0xff] %v553_v4 }
  0xeb   : > { %1088 = shalt.err (!%p1085_p13)
}
  0xec   : > { %s1153_s9 = smov 256   ;;  %s1154_s6 = smov 512  }
  0xed   : > { %s1155_s7 = smov 16  }
  0xee   : > { %895 = dma.vmem_to_hbm [thread:$0]  (%p1266_p0), %s575_s4, 512, %s577_s5, %s559_s15, %s1153_s9, %s1154_s6, %s1155_s7  }
  0xef PF: > { %s591_s10 = sand.u32 1, %s1127_s12   ;;  %p909_p3 = pnand %p699_p4, %p1270_p2 }
  0xf0   : > { %s592_s11 = scalar_lea.sflag [#allocation4], %s591_s10 }
  0xf1   : > { %p910_p5 = pneg %p909_p3 }
  0xf3   : > { %1122 = dma.done.wait (%p910_p5), %s592_s11, 512  }
  0xf4   : > { %1124 = vsyncadd (%p910_p5), %s592_s11, 4294966784  ;;  %s20_s17 = sadd.s32 1, %s1147_s17   ;;  %s1437_s12 = smov %s1131_s13 }
  0xf5   : > { %p17_p1 = scmp.ge.s32.totalorder %s20_s17, 4   ;;  %s1438_s13 = smov %s1135_s14 }
  0xf6   : > { %s1439_s14 = smov %s1227_s24  ;;  %s1440_s15 = smov %s1143_s16 }
  0xf7   : > { %s1441_s16 = smov %s1443_s18  ;;  %19 = sbr.rel (!%p17_p1) target bundleno = 10 (0xa), region = 94 }
  0xfc   :  { %598 = vsyncpa [#allocation3], 1 }
  0xfd   :  { %600 = vsyncpa [#allocation3 + $0x1], 1 }
  0xfe   :  { %601 = vsyncpa [#allocation6], 1 }
  0xff   :  { %603 = vsyncpa [#allocation6 + $0x1], 1 }
 0x100   :  { %604 = vsyncpa [#allocation4], 1 }
 0x101   :  { %606 = vsyncpa [#allocation4 + $0x1], 1 }

</bundles_post_ra>
